<compile_context>
chip_gen: v7x
topology: tpu7x:2x2x1
jax: 0.10.0
libtpu: 0.0.40
codegen_flags: <defaults>
</compile_context>

<pallas_src>
import functools

import jax
import jax.numpy as jnp
from jax.experimental import pallas as pl
from jax.experimental.pallas import tpu as pltpu


# ----------------------------------------------------------------------------
# Tiling helpers
# ----------------------------------------------------------------------------

def _pick_batch_block(B, T, target_rows=512):
    """Batch elements per grid step.

    Picks bb so bb*T ~ target_rows MXU rows.  bb is either B itself or a
    multiple of 8 (keeps the (8,128) block constraint on the (B, 64) output).
    No forced split on single-TC parts; large B naturally yields a multi-step
    'parallel' grid (dual-TC on v7x).
    """
    divisors = [d for d in range(1, B + 1) if B % d == 0]
    aligned = [d for d in divisors if d == B or d % 8 == 0]
    cands = aligned if aligned else [B]
    fitting = [d for d in cands if d * T <= max(target_rows, T)]
    return max(fitting) if fitting else min(cands)


# ----------------------------------------------------------------------------
# Fused kernel: all TemporalBlocks + mean/FC/ReLU head for one batch tile
# ----------------------------------------------------------------------------

def _fused_tcn_kernel(*refs, k, dilations, has_down, inv_T, compute_dtype):
    """Whole network for one (bb, T, Cin) batch tile; activations stay in VMEM.

    refs = [x, (w1, b1, w2, b2[, wd, bd]) per block..., fc_w, fc_b, out]
      x     (bb, T, Cin)
      w1/w2 (k, Cin, Cout) compute_dtype, wd (Cin, Cout) compute_dtype
      b*    (1, Cout) float32
      fc_w  (C_last, H) compute_dtype, fc_b (1, H) float32
      out   (bb, H)
    """
    it = iter(refs)
    x_ref = next(it)
    blk_refs = []
    for hd in has_down:
        w1, b1, w2, b2 = next(it), next(it), next(it), next(it)
        wd = next(it) if hd else None
        bd = next(it) if hd else None
        blk_refs.append((w1, b1, w2, b2, wd, bd))
    fcw_ref, fcb_ref, o_ref = next(it), next(it), next(it)

    bb, T, _ = x_ref.shape

    def causal_conv(z_f32, w_ref, b_ref, d):
        """Dilated causal conv: out[t] = sum_j z[t-(k-1-j)*d] @ w[j] + b.

        Taps are built by shifting the activation along T with a zero fill at
        the causal edge (no padded VMEM scratch round-trip).
        """
        cz = z_f32.shape[2]
        z0 = z_f32.astype(compute_dtype).reshape(bb * T, cz)
        acc = jnp.dot(z0, w_ref[k - 1], preferred_element_type=jnp.float32)
        for j in range(k - 1):
            s = (k - 1 - j) * d
            if s >= T:
                continue                    # tap lies entirely in the causal zero padding
            zs = jnp.concatenate(
                [jnp.zeros((bb, s, cz), jnp.float32), z_f32[:, :T - s, :]], axis=1)
            acc = acc + jnp.dot(zs.astype(compute_dtype).reshape(bb * T, cz),
                                w_ref[j], preferred_element_type=jnp.float32)
        return acc + b_ref[...].astype(jnp.float32)           # (bb*T, Cout)

    y = x_ref[...].astype(jnp.float32)                         # (bb, T, Cin)

    for (w1, b1, w2, b2, wd, bd), d in zip(blk_refs, dilations):
        cin = y.shape[2]
        cout = w1.shape[2]
        h = jnp.maximum(causal_conv(y, w1, b1, d), 0.0)        # conv1 + ReLU
        # dropout1: identity in eval mode
        h = jnp.maximum(causal_conv(h.reshape(bb, T, cout), w2, b2, d), 0.0)
        # dropout2: identity in eval mode
        if wd is not None:                                     # 1x1 downsample residual
            res = (jnp.dot(y.astype(compute_dtype).reshape(bb * T, cin), wd[...],
                           preferred_element_type=jnp.float32)
                   + bd[...].astype(jnp.float32))
        else:                                                  # identity residual (cin == cout)
            res = y.reshape(bb * T, cin)
        y = jnp.maximum(h + res, 0.0).reshape(bb, T, cout)

    # Head: mean over T -> Linear -> ReLU, fused (no (B, T, C_last) HBM round-trip).
    m = jnp.sum(y, axis=1) * inv_T                             # (bb, C_last) f32
    out = (jnp.dot(m.astype(compute_dtype), fcw_ref[...],
                   preferred_element_type=jnp.float32)
           + fcb_ref[...].astype(jnp.float32))
    o_ref[...] = jnp.maximum(out, 0.0).astype(o_ref.dtype)


# ----------------------------------------------------------------------------
# Wrapper (single pallas_call for the whole forward)
# ----------------------------------------------------------------------------

def financial_branch_tcn(params, x, lengths=None, *, compute_dtype=jnp.bfloat16):
    """x: (B, T, input_dim) -> (B, 64).  `lengths` is unused (matches PyTorch)."""
    del lengths
    B, T, Cin = x.shape
    blocks = params["blocks"]
    dilations = tuple(2 ** i for i in range(len(blocks)))
    has_down = tuple("wd" in blk for blk in blocks)
    k = int(blocks[0]["w1"].shape[0])
    C_last, H = params["fc_w"].shape

    bb = _pick_batch_block(B, T)

    def const_spec(shape):
        nd = len(shape)
        return pl.BlockSpec(tuple(shape), lambda i, _n=nd: (0,) * _n)

    args = [x]
    in_specs = [pl.BlockSpec((bb, T, Cin), lambda i: (i, 0, 0))]
    flops = 0
    in_c = Cin
    for blk, hd in zip(blocks, has_down):
        out_c = int(blk["w1"].shape[2])
        if not hd:
            assert in_c == out_c, "identity residual requires Cin == Cout"
        w1 = blk["w1"].astype(compute_dtype)                   # pre-cast MXU operands once
        w2 = blk["w2"].astype(compute_dtype)
        args += [w1, blk["b1"].reshape(1, out_c), w2, blk["b2"].reshape(1, out_c)]
        in_specs += [const_spec(w1.shape), const_spec((1, out_c)),
                     const_spec(w2.shape), const_spec((1, out_c))]
        flops += 2 * B * T * k * (in_c * out_c + out_c * out_c)
        if hd:
            wd = blk["wd"].astype(compute_dtype)
            args += [wd, blk["bd"].reshape(1, out_c)]
            in_specs += [const_spec(wd.shape), const_spec((1, out_c))]
            flops += 2 * B * T * in_c * out_c
        in_c = out_c

    fc_w = params["fc_w"].astype(compute_dtype)
    args += [fc_w, params["fc_b"].reshape(1, H)]
    in_specs += [const_spec(fc_w.shape), const_spec((1, H))]
    flops += B * T * C_last + 2 * B * C_last * H

    weight_bytes = sum(int(a.size) * a.dtype.itemsize for a in args[1:])
    bytes_accessed = (int(x.size) * x.dtype.itemsize + weight_bytes
                      + B * H * x.dtype.itemsize)

    # VMEM budget: double-buffered I/O + resident weights + live activation temporaries.
    max_c = max([Cin, int(H)] + [int(blk["w1"].shape[2]) for blk in blocks])
    est = (2 * (bb * T * Cin * x.dtype.itemsize + bb * H * x.dtype.itemsize + weight_bytes)
           + 12 * bb * T * max_c * 4)
    cp = dict(dimension_semantics=("parallel",))
    if est > (32 << 20):                                       # exceed default scoped VMEM
        cp["vmem_limit_bytes"] = int(min(est + (8 << 20), 64 << 20))  # v7x physical cap

    kern = functools.partial(_fused_tcn_kernel, k=k, dilations=dilations,
                             has_down=has_down, inv_T=1.0 / T,
                             compute_dtype=compute_dtype)
    return pl.pallas_call(
        kern,
        out_shape=jax.ShapeDtypeStruct((B, H), x.dtype),
        grid=(B // bb,),
        in_specs=in_specs,
        out_specs=pl.BlockSpec((bb, H), lambda i: (i, 0)),
        compiler_params=pltpu.CompilerParams(**cp),
        cost_estimate=pl.CostEstimate(flops=int(flops), transcendentals=0,
                                      bytes_accessed=int(bytes_accessed)),
    )(*args)


# ----------------------------------------------------------------------------
# Parameters
# ----------------------------------------------------------------------------

def init_params(key, input_dim, tcn_channels, kernel_size, fc_out=64):
    params = {"blocks": []}
    in_c = input_dim
    for out_c in tcn_channels:
        key, k1, k2, k3, k4, k5, k6 = jax.random.split(key, 7)
        b1 = 1.0 / (in_c * kernel_size) ** 0.5
        b2 = 1.0 / (out_c * kernel_size) ** 0.5
        blk = {
            "w1": jax.random.uniform(k1, (kernel_size, in_c, out_c), jnp.float32, -b1, b1),
            "b1": jax.random.uniform(k2, (out_c,), jnp.float32, -b1, b1),
            "w2": jax.random.uniform(k3, (kernel_size, out_c, out_c), jnp.float32, -b2, b2),
            "b2": jax.random.uniform(k4, (out_c,), jnp.float32, -b2, b2),
        }
        if in_c != out_c:   # downsample 1x1 conv only when channel count changes
            bd = 1.0 / in_c ** 0.5
            blk["wd"] = jax.random.uniform(k5, (in_c, out_c), jnp.float32, -bd, bd)
            blk["bd"] = jax.random.uniform(k6, (out_c,), jnp.float32, -bd, bd)
        params["blocks"].append(blk)
        in_c = out_c
    key, kf1, kf2 = jax.random.split(key, 3)
    bf = 1.0 / in_c ** 0.5
    params["fc_w"] = jax.random.uniform(kf1, (in_c, fc_out), jnp.float32, -bf, bf)
    params["fc_b"] = jax.random.uniform(kf2, (fc_out,), jnp.float32, -bf, bf)
    return params


# ----------------------------------------------------------------------------
# Pure-JAX reference (same math, no Pallas) for a numerical sanity check
# ----------------------------------------------------------------------------

def _ref_forward(params, x):
    def causal_conv(z, w, b, d):
        kk = w.shape[0]
        pad = (kk - 1) * d
        zp = jnp.pad(z, ((0, 0), (pad, 0), (0, 0)))
        T = z.shape[1]
        acc = jnp.zeros((z.shape[0], T, w.shape[2]), jnp.float32)
        for j in range(kk):
            acc = acc + jnp.einsum('btc,cd->btd', zp[:, j * d:j * d + T, :], w[j])
        return acc + b[None, None, :]

    y = x
    for i, blk in enumerate(params["blocks"]):
        d = 2 ** i
        inp = y
        h = jax.nn.relu(causal_conv(inp, blk["w1"], blk["b1"], d))
        h = jax.nn.relu(causal_conv(h, blk["w2"], blk["b2"], d))
        res = (jnp.einsum('btc,cd->btd', inp, blk["wd"]) + blk["bd"][None, None, :]
               if "wd" in blk else inp)
        y = jax.nn.relu(h + res)
    m = jnp.mean(y, axis=1)
    return jax.nn.relu(m @ params["fc_w"] + params["fc_b"])


# ----------------------------------------------------------------------------

if __name__ == "__main__":
    B, T, input_dim = 2, 16, 8
    tcn_channels = [8, 32]      # first block: identity residual; second: 1x1 downsample
    kernel_size = 2

    key = jax.random.PRNGKey(0)
    kx, kp = jax.random.split(key)
    x = jax.random.normal(kx, (B, T, input_dim), dtype=jnp.float32)
    lengths = jnp.full((B,), T, dtype=jnp.int32)   # unused, matches PyTorch signature

    params = init_params(kp, input_dim, tcn_channels, kernel_size)
    ref = jax.block_until_ready(_ref_forward(params, x))

    # f32 MXU path (matches reference tightly)
    fwd_f32 = jax.jit(functools.partial(financial_branch_tcn, compute_dtype=jnp.float32))
    out = jax.block_until_ready(fwd_f32(params, x, lengths))
    assert out.shape == (B, 64), out.shape
    assert jnp.allclose(out, ref, atol=1e-4, rtol=1e-4), \
        float(jnp.max(jnp.abs(out - ref)))

    # bf16 MXU operands (default fast path on v6e/v7x), f32 accumulation.
    fwd_bf16 = jax.jit(financial_branch_tcn)
    out_bf16 = jax.block_until_ready(fwd_bf16(params, x, lengths))
    assert out_bf16.shape == (B, 64), out_bf16.shape
    assert jnp.allclose(out_bf16, ref, atol=5e-2, rtol=5e-2), \
        float(jnp.max(jnp.abs(out_bf16 - ref)))

    print("KERNEL_OK")
</pallas_src>

<mosaic_0001>
module attributes {stable_mosaic.version = 11 : i64} {
  func.func @_fused_tcn_kernel(%arg0: i32, %arg1: memref<2x16x8xf32, #tpu.memory_space<vmem>>, %arg2: memref<2x8x8xf32, #tpu.memory_space<vmem>>, %arg3: memref<1x8xf32, #tpu.memory_space<vmem>>, %arg4: memref<2x8x8xf32, #tpu.memory_space<vmem>>, %arg5: memref<1x8xf32, #tpu.memory_space<vmem>>, %arg6: memref<2x8x32xf32, #tpu.memory_space<vmem>>, %arg7: memref<1x32xf32, #tpu.memory_space<vmem>>, %arg8: memref<2x32x32xf32, #tpu.memory_space<vmem>>, %arg9: memref<1x32xf32, #tpu.memory_space<vmem>>, %arg10: memref<8x32xf32, #tpu.memory_space<vmem>>, %arg11: memref<1x32xf32, #tpu.memory_space<vmem>>, %arg12: memref<32x64xf32, #tpu.memory_space<vmem>>, %arg13: memref<1x64xf32, #tpu.memory_space<vmem>>, %arg14: memref<2x64xf32, #tpu.memory_space<vmem>>) attributes {dimension_semantics = [#tpu.dimension_semantics<parallel>], iteration_bounds = array<i64: 1>, scalar_prefetch = 0 : i64, scratch_operands = 0 : i64, tpu.core_type = #tpu.core_type<tc>, window_params = [{transform_indices = @transform_0, window_bounds = array<i64: 2, 16, 8>}, {pipeline_mode = #tpu.pipeline_mode<synchronous>, transform_indices = @transform_1, window_bounds = array<i64: 2, 8, 8>}, {pipeline_mode = #tpu.pipeline_mode<synchronous>, transform_indices = @transform_2, window_bounds = array<i64: 1, 8>}, {pipeline_mode = #tpu.pipeline_mode<synchronous>, transform_indices = @transform_3, window_bounds = array<i64: 2, 8, 8>}, {pipeline_mode = #tpu.pipeline_mode<synchronous>, transform_indices = @transform_4, window_bounds = array<i64: 1, 8>}, {pipeline_mode = #tpu.pipeline_mode<synchronous>, transform_indices = @transform_5, window_bounds = array<i64: 2, 8, 32>}, {pipeline_mode = #tpu.pipeline_mode<synchronous>, transform_indices = @transform_6, window_bounds = array<i64: 1, 32>}, {pipeline_mode = #tpu.pipeline_mode<synchronous>, transform_indices = @transform_7, window_bounds = array<i64: 2, 32, 32>}, {pipeline_mode = #tpu.pipeline_mode<synchronous>, transform_indices = @transform_8, window_bounds = array<i64: 1, 32>}, {pipeline_mode = #tpu.pipeline_mode<synchronous>, transform_indices = @transform_9, window_bounds = array<i64: 8, 32>}, {pipeline_mode = #tpu.pipeline_mode<synchronous>, transform_indices = @transform_10, window_bounds = array<i64: 1, 32>}, {pipeline_mode = #tpu.pipeline_mode<synchronous>, transform_indices = @transform_11, window_bounds = array<i64: 32, 64>}, {pipeline_mode = #tpu.pipeline_mode<synchronous>, transform_indices = @transform_12, window_bounds = array<i64: 1, 64>}, {transform_indices = @transform_13, window_bounds = array<i64: 2, 64>}]} {
    %c0 = arith.constant 0 : index
    %c0_0 = arith.constant 0 : index
    %c0_1 = arith.constant 0 : index
    %0 = vector.load %arg1[%c0, %c0_0, %c0_1] : memref<2x16x8xf32, #tpu.memory_space<vmem>>, vector<2x16x8xf32>
    %1 = vector.shape_cast %0 : vector<2x16x8xf32> to vector<32x8xf32>
    %c1 = arith.constant 1 : index
    %c0_2 = arith.constant 0 : index
    %c0_3 = arith.constant 0 : index
    %2 = vector.load %arg2[%c1, %c0_2, %c0_3] : memref<2x8x8xf32, #tpu.memory_space<vmem>>, vector<1x8x8xf32>
    %3 = vector.shape_cast %2 : vector<1x8x8xf32> to vector<8x8xf32>
    %cst = arith.constant dense<0.000000e+00> : vector<32x8xf32>
    %4 = tpu.matmul %1, %3, %cst {dimension_numbers = #tpu.dot_dimension_numbers<[1], [0], [0], [1], [0, 0, 1, 1], [], []>} : vector<32x8xf32>, vector<8x8xf32>, vector<32x8xf32> -> vector<32x8xf32>
    %cst_4 = arith.constant 0.000000e+00 : f32
    %5 = vector.broadcast %cst_4 : f32 to vector<2x1x8xf32>
    %6 = vector.extract_strided_slice %0 {offsets = [0, 0, 0], sizes = [2, 15, 8], strides = [1, 1, 1]} : vector<2x16x8xf32> to vector<2x15x8xf32>
    %7 = tpu.concatenate %5, %6 in 1 : vector<2x1x8xf32>, vector<2x15x8xf32> -> vector<2x16x8xf32>
    %8 = vector.shape_cast %7 : vector<2x16x8xf32> to vector<32x8xf32>
    %c0_5 = arith.constant 0 : index
    %c0_6 = arith.constant 0 : index
    %c0_7 = arith.constant 0 : index
    %9 = vector.load %arg2[%c0_5, %c0_6, %c0_7] : memref<2x8x8xf32, #tpu.memory_space<vmem>>, vector<1x8x8xf32>
    %10 = vector.shape_cast %9 : vector<1x8x8xf32> to vector<8x8xf32>
    %cst_8 = arith.constant dense<0.000000e+00> : vector<32x8xf32>
    %11 = tpu.matmul %8, %10, %cst_8 {dimension_numbers = #tpu.dot_dimension_numbers<[1], [0], [0], [1], [0, 0, 1, 1], [], []>} : vector<32x8xf32>, vector<8x8xf32>, vector<32x8xf32> -> vector<32x8xf32>
    %12 = arith.addf %4, %11 : vector<32x8xf32>
    %c0_9 = arith.constant 0 : index
    %c0_10 = arith.constant 0 : index
    %13 = vector.load %arg3[%c0_9, %c0_10] : memref<1x8xf32, #tpu.memory_space<vmem>>, vector<1x8xf32>
    %14 = vector.broadcast %13 : vector<1x8xf32> to vector<32x8xf32>
    %15 = arith.addf %12, %14 : vector<32x8xf32>
    %cst_11 = arith.constant 0.000000e+00 : f32
    %16 = vector.broadcast %cst_11 : f32 to vector<32x8xf32>
    %17 = arith.maximumf %15, %16 : vector<32x8xf32>
    %18 = vector.shape_cast %17 : vector<32x8xf32> to vector<2x16x8xf32>
    %19 = vector.shape_cast %18 : vector<2x16x8xf32> to vector<32x8xf32>
    %c1_12 = arith.constant 1 : index
    %c0_13 = arith.constant 0 : index
    %c0_14 = arith.constant 0 : index
    %20 = vector.load %arg4[%c1_12, %c0_13, %c0_14] : memref<2x8x8xf32, #tpu.memory_space<vmem>>, vector<1x8x8xf32>
    %21 = vector.shape_cast %20 : vector<1x8x8xf32> to vector<8x8xf32>
    %cst_15 = arith.constant dense<0.000000e+00> : vector<32x8xf32>
    %22 = tpu.matmul %19, %21, %cst_15 {dimension_numbers = #tpu.dot_dimension_numbers<[1], [0], [0], [1], [0, 0, 1, 1], [], []>} : vector<32x8xf32>, vector<8x8xf32>, vector<32x8xf32> -> vector<32x8xf32>
    %cst_16 = arith.constant 0.000000e+00 : f32
    %23 = vector.broadcast %cst_16 : f32 to vector<2x1x8xf32>
    %24 = vector.extract_strided_slice %18 {offsets = [0, 0, 0], sizes = [2, 15, 8], strides = [1, 1, 1]} : vector<2x16x8xf32> to vector<2x15x8xf32>
    %25 = tpu.concatenate %23, %24 in 1 : vector<2x1x8xf32>, vector<2x15x8xf32> -> vector<2x16x8xf32>
    %26 = vector.shape_cast %25 : vector<2x16x8xf32> to vector<32x8xf32>
    %c0_17 = arith.constant 0 : index
    %c0_18 = arith.constant 0 : index
    %c0_19 = arith.constant 0 : index
    %27 = vector.load %arg4[%c0_17, %c0_18, %c0_19] : memref<2x8x8xf32, #tpu.memory_space<vmem>>, vector<1x8x8xf32>
    %28 = vector.shape_cast %27 : vector<1x8x8xf32> to vector<8x8xf32>
    %cst_20 = arith.constant dense<0.000000e+00> : vector<32x8xf32>
    %29 = tpu.matmul %26, %28, %cst_20 {dimension_numbers = #tpu.dot_dimension_numbers<[1], [0], [0], [1], [0, 0, 1, 1], [], []>} : vector<32x8xf32>, vector<8x8xf32>, vector<32x8xf32> -> vector<32x8xf32>
    %30 = arith.addf %22, %29 : vector<32x8xf32>
    %c0_21 = arith.constant 0 : index
    %c0_22 = arith.constant 0 : index
    %31 = vector.load %arg5[%c0_21, %c0_22] : memref<1x8xf32, #tpu.memory_space<vmem>>, vector<1x8xf32>
    %32 = vector.broadcast %31 : vector<1x8xf32> to vector<32x8xf32>
    %33 = arith.addf %30, %32 : vector<32x8xf32>
    %cst_23 = arith.constant 0.000000e+00 : f32
    %34 = vector.broadcast %cst_23 : f32 to vector<32x8xf32>
    %35 = arith.maximumf %33, %34 : vector<32x8xf32>
    %36 = vector.shape_cast %0 : vector<2x16x8xf32> to vector<32x8xf32>
    %37 = arith.addf %35, %36 : vector<32x8xf32>
    %cst_24 = arith.constant 0.000000e+00 : f32
    %38 = vector.broadcast %cst_24 : f32 to vector<32x8xf32>
    %39 = arith.maximumf %37, %38 : vector<32x8xf32>
    %40 = vector.shape_cast %39 : vector<32x8xf32> to vector<2x16x8xf32>
    %41 = vector.shape_cast %40 : vector<2x16x8xf32> to vector<32x8xf32>
    %c1_25 = arith.constant 1 : index
    %c0_26 = arith.constant 0 : index
    %c0_27 = arith.constant 0 : index
    %42 = vector.load %arg6[%c1_25, %c0_26, %c0_27] : memref<2x8x32xf32, #tpu.memory_space<vmem>>, vector<1x8x32xf32>
    %43 = vector.shape_cast %42 : vector<1x8x32xf32> to vector<8x32xf32>
    %cst_28 = arith.constant dense<0.000000e+00> : vector<32x32xf32>
    %44 = tpu.matmul %41, %43, %cst_28 {dimension_numbers = #tpu.dot_dimension_numbers<[1], [0], [0], [1], [0, 0, 1, 1], [], []>} : vector<32x8xf32>, vector<8x32xf32>, vector<32x32xf32> -> vector<32x32xf32>
    %cst_29 = arith.constant 0.000000e+00 : f32
    %45 = vector.broadcast %cst_29 : f32 to vector<2x2x8xf32>
    %46 = vector.extract_strided_slice %40 {offsets = [0, 0, 0], sizes = [2, 14, 8], strides = [1, 1, 1]} : vector<2x16x8xf32> to vector<2x14x8xf32>
    %47 = tpu.concatenate %45, %46 in 1 : vector<2x2x8xf32>, vector<2x14x8xf32> -> vector<2x16x8xf32>
    %48 = vector.shape_cast %47 : vector<2x16x8xf32> to vector<32x8xf32>
    %c0_30 = arith.constant 0 : index
    %c0_31 = arith.constant 0 : index
    %c0_32 = arith.constant 0 : index
    %49 = vector.load %arg6[%c0_30, %c0_31, %c0_32] : memref<2x8x32xf32, #tpu.memory_space<vmem>>, vector<1x8x32xf32>
    %50 = vector.shape_cast %49 : vector<1x8x32xf32> to vector<8x32xf32>
    %cst_33 = arith.constant dense<0.000000e+00> : vector<32x32xf32>
    %51 = tpu.matmul %48, %50, %cst_33 {dimension_numbers = #tpu.dot_dimension_numbers<[1], [0], [0], [1], [0, 0, 1, 1], [], []>} : vector<32x8xf32>, vector<8x32xf32>, vector<32x32xf32> -> vector<32x32xf32>
    %52 = arith.addf %44, %51 : vector<32x32xf32>
    %c0_34 = arith.constant 0 : index
    %c0_35 = arith.constant 0 : index
    %53 = vector.load %arg7[%c0_34, %c0_35] : memref<1x32xf32, #tpu.memory_space<vmem>>, vector<1x32xf32>
    %54 = vector.broadcast %53 : vector<1x32xf32> to vector<32x32xf32>
    %55 = arith.addf %52, %54 : vector<32x32xf32>
    %cst_36 = arith.constant 0.000000e+00 : f32
    %56 = vector.broadcast %cst_36 : f32 to vector<32x32xf32>
    %57 = arith.maximumf %55, %56 : vector<32x32xf32>
    %58 = vector.shape_cast %57 : vector<32x32xf32> to vector<2x16x32xf32>
    %59 = vector.shape_cast %58 : vector<2x16x32xf32> to vector<32x32xf32>
    %c1_37 = arith.constant 1 : index
    %c0_38 = arith.constant 0 : index
    %c0_39 = arith.constant 0 : index
    %60 = vector.load %arg8[%c1_37, %c0_38, %c0_39] : memref<2x32x32xf32, #tpu.memory_space<vmem>>, vector<1x32x32xf32>
    %61 = vector.shape_cast %60 : vector<1x32x32xf32> to vector<32x32xf32>
    %cst_40 = arith.constant dense<0.000000e+00> : vector<32x32xf32>
    %62 = tpu.matmul %59, %61, %cst_40 {dimension_numbers = #tpu.dot_dimension_numbers<[1], [0], [0], [1], [0, 0, 1, 1], [], []>} : vector<32x32xf32>, vector<32x32xf32>, vector<32x32xf32> -> vector<32x32xf32>
    %cst_41 = arith.constant 0.000000e+00 : f32
    %63 = vector.broadcast %cst_41 : f32 to vector<2x2x32xf32>
    %64 = vector.extract_strided_slice %58 {offsets = [0, 0, 0], sizes = [2, 14, 32], strides = [1, 1, 1]} : vector<2x16x32xf32> to vector<2x14x32xf32>
    %65 = tpu.concatenate %63, %64 in 1 : vector<2x2x32xf32>, vector<2x14x32xf32> -> vector<2x16x32xf32>
    %66 = vector.shape_cast %65 : vector<2x16x32xf32> to vector<32x32xf32>
    %c0_42 = arith.constant 0 : index
    %c0_43 = arith.constant 0 : index
    %c0_44 = arith.constant 0 : index
    %67 = vector.load %arg8[%c0_42, %c0_43, %c0_44] : memref<2x32x32xf32, #tpu.memory_space<vmem>>, vector<1x32x32xf32>
    %68 = vector.shape_cast %67 : vector<1x32x32xf32> to vector<32x32xf32>
    %cst_45 = arith.constant dense<0.000000e+00> : vector<32x32xf32>
    %69 = tpu.matmul %66, %68, %cst_45 {dimension_numbers = #tpu.dot_dimension_numbers<[1], [0], [0], [1], [0, 0, 1, 1], [], []>} : vector<32x32xf32>, vector<32x32xf32>, vector<32x32xf32> -> vector<32x32xf32>
    %70 = arith.addf %62, %69 : vector<32x32xf32>
    %c0_46 = arith.constant 0 : index
    %c0_47 = arith.constant 0 : index
    %71 = vector.load %arg9[%c0_46, %c0_47] : memref<1x32xf32, #tpu.memory_space<vmem>>, vector<1x32xf32>
    %72 = vector.broadcast %71 : vector<1x32xf32> to vector<32x32xf32>
    %73 = arith.addf %70, %72 : vector<32x32xf32>
    %cst_48 = arith.constant 0.000000e+00 : f32
    %74 = vector.broadcast %cst_48 : f32 to vector<32x32xf32>
    %75 = arith.maximumf %73, %74 : vector<32x32xf32>
    %76 = vector.shape_cast %40 : vector<2x16x8xf32> to vector<32x8xf32>
    %c0_49 = arith.constant 0 : index
    %c0_50 = arith.constant 0 : index
    %77 = vector.load %arg10[%c0_49, %c0_50] : memref<8x32xf32, #tpu.memory_space<vmem>>, vector<8x32xf32>
    %cst_51 = arith.constant dense<0.000000e+00> : vector<32x32xf32>
    %78 = tpu.matmul %76, %77, %cst_51 {dimension_numbers = #tpu.dot_dimension_numbers<[1], [0], [0], [1], [0, 0, 1, 1], [], []>} : vector<32x8xf32>, vector<8x32xf32>, vector<32x32xf32> -> vector<32x32xf32>
    %c0_52 = arith.constant 0 : index
    %c0_53 = arith.constant 0 : index
    %79 = vector.load %arg11[%c0_52, %c0_53] : memref<1x32xf32, #tpu.memory_space<vmem>>, vector<1x32xf32>
    %80 = vector.broadcast %79 : vector<1x32xf32> to vector<32x32xf32>
    %81 = arith.addf %78, %80 : vector<32x32xf32>
    %82 = arith.addf %75, %81 : vector<32x32xf32>
    %cst_54 = arith.constant 0.000000e+00 : f32
    %83 = vector.broadcast %cst_54 : f32 to vector<32x32xf32>
    %84 = arith.maximumf %82, %83 : vector<32x32xf32>
    %85 = vector.shape_cast %84 : vector<32x32xf32> to vector<2x16x32xf32>
    %cst_55 = arith.constant dense<0.000000e+00> : vector<2x32xf32>
    %86 = vector.multi_reduction <add>, %85, %cst_55 [1] : vector<2x16x32xf32> to vector<2x32xf32>
    %cst_56 = arith.constant 6.250000e-02 : f32
    %87 = vector.broadcast %cst_56 : f32 to vector<2x32xf32>
    %88 = arith.mulf %86, %87 : vector<2x32xf32>
    %c0_57 = arith.constant 0 : index
    %c0_58 = arith.constant 0 : index
    %89 = vector.load %arg12[%c0_57, %c0_58] : memref<32x64xf32, #tpu.memory_space<vmem>>, vector<32x64xf32>
    %cst_59 = arith.constant dense<0.000000e+00> : vector<2x64xf32>
    %90 = tpu.matmul %88, %89, %cst_59 {dimension_numbers = #tpu.dot_dimension_numbers<[1], [0], [0], [1], [0, 0, 1, 1], [], []>} : vector<2x32xf32>, vector<32x64xf32>, vector<2x64xf32> -> vector<2x64xf32>
    %c0_60 = arith.constant 0 : index
    %c0_61 = arith.constant 0 : index
    %91 = vector.load %arg13[%c0_60, %c0_61] : memref<1x64xf32, #tpu.memory_space<vmem>>, vector<1x64xf32>
    %92 = vector.broadcast %91 : vector<1x64xf32> to vector<2x64xf32>
    %93 = arith.addf %90, %92 : vector<2x64xf32>
    %cst_62 = arith.constant 0.000000e+00 : f32
    %94 = vector.broadcast %cst_62 : f32 to vector<2x64xf32>
    %95 = arith.maximumf %93, %94 : vector<2x64xf32>
    %c0_63 = arith.constant 0 : index
    %c0_64 = arith.constant 0 : index
    %96 = vector.load %arg14[%c0_63, %c0_64] : memref<2x64xf32, #tpu.memory_space<vmem>>, vector<2x64xf32>
    tpu.vector_store %arg14[%c0_63, %c0_64], %95 {strides = array<i32>} : memref<2x64xf32, #tpu.memory_space<vmem>>, vector<2x64xf32>,
    return
  }
  func.func @transform_0(%arg0: i32) -> (i32, i32, i32) {
    %c0_i32 = arith.constant 0 : i32
    %c0_i32_0 = arith.constant 0 : i32
    %c0_i32_1 = arith.constant 0 : i32
    return %arg0, %c0_i32, %c0_i32_0 : i32, i32, i32
  }
  func.func @transform_1(%arg0: i32) -> (i32, i32, i32) {
    %c0_i32 = arith.constant 0 : i32
    %c0_i32_0 = arith.constant 0 : i32
    %c0_i32_1 = arith.constant 0 : i32
    %c0_i32_2 = arith.constant 0 : i32
    return %c0_i32, %c0_i32_0, %c0_i32_1 : i32, i32, i32
  }
  func.func @transform_2(%arg0: i32) -> (i32, i32) {
    %c0_i32 = arith.constant 0 : i32
    %c0_i32_0 = arith.constant 0 : i32
    %c0_i32_1 = arith.constant 0 : i32
    return %c0_i32, %c0_i32_0 : i32, i32
  }
  func.func @transform_3(%arg0: i32) -> (i32, i32, i32) {
    %c0_i32 = arith.constant 0 : i32
    %c0_i32_0 = arith.constant 0 : i32
    %c0_i32_1 = arith.constant 0 : i32
    %c0_i32_2 = arith.constant 0 : i32
    return %c0_i32, %c0_i32_0, %c0_i32_1 : i32, i32, i32
  }
  func.func @transform_4(%arg0: i32) -> (i32, i32) {
    %c0_i32 = arith.constant 0 : i32
    %c0_i32_0 = arith.constant 0 : i32
    %c0_i32_1 = arith.constant 0 : i32
    return %c0_i32, %c0_i32_0 : i32, i32
  }
  func.func @transform_5(%arg0: i32) -> (i32, i32, i32) {
    %c0_i32 = arith.constant 0 : i32
    %c0_i32_0 = arith.constant 0 : i32
    %c0_i32_1 = arith.constant 0 : i32
    %c0_i32_2 = arith.constant 0 : i32
    return %c0_i32, %c0_i32_0, %c0_i32_1 : i32, i32, i32
  }
  func.func @transform_6(%arg0: i32) -> (i32, i32) {
    %c0_i32 = arith.constant 0 : i32
    %c0_i32_0 = arith.constant 0 : i32
    %c0_i32_1 = arith.constant 0 : i32
    return %c0_i32, %c0_i32_0 : i32, i32
  }
  func.func @transform_7(%arg0: i32) -> (i32, i32, i32) {
    %c0_i32 = arith.constant 0 : i32
    %c0_i32_0 = arith.constant 0 : i32
    %c0_i32_1 = arith.constant 0 : i32
    %c0_i32_2 = arith.constant 0 : i32
    return %c0_i32, %c0_i32_0, %c0_i32_1 : i32, i32, i32
  }
  func.func @transform_8(%arg0: i32) -> (i32, i32) {
    %c0_i32 = arith.constant 0 : i32
    %c0_i32_0 = arith.constant 0 : i32
    %c0_i32_1 = arith.constant 0 : i32
    return %c0_i32, %c0_i32_0 : i32, i32
  }
  func.func @transform_9(%arg0: i32) -> (i32, i32) {
    %c0_i32 = arith.constant 0 : i32
    %c0_i32_0 = arith.constant 0 : i32
    %c0_i32_1 = arith.constant 0 : i32
    return %c0_i32, %c0_i32_0 : i32, i32
  }
  func.func @transform_10(%arg0: i32) -> (i32, i32) {
    %c0_i32 = arith.constant 0 : i32
    %c0_i32_0 = arith.constant 0 : i32
    %c0_i32_1 = arith.constant 0 : i32
    return %c0_i32, %c0_i32_0 : i32, i32
  }
  func.func @transform_11(%arg0: i32) -> (i32, i32) {
    %c0_i32 = arith.constant 0 : i32
    %c0_i32_0 = arith.constant 0 : i32
    %c0_i32_1 = arith.constant 0 : i32
    return %c0_i32, %c0_i32_0 : i32, i32
  }
  func.func @transform_12(%arg0: i32) -> (i32, i32) {
    %c0_i32 = arith.constant 0 : i32
    %c0_i32_0 = arith.constant 0 : i32
    %c0_i32_1 = arith.constant 0 : i32
    return %c0_i32, %c0_i32_0 : i32, i32
  }
  func.func @transform_13(%arg0: i32) -> (i32, i32) {
    %c0_i32 = arith.constant 0 : i32
    %c0_i32_0 = arith.constant 0 : i32
    return %arg0, %c0_i32 : i32, i32
  }
}

</mosaic_0001>

<bundles_post_ra>
// kernel: financial_branch_tcn.1
= control target key start
LH: loop header
LB: loop body
LE: loop exit
PB: predicated region body
PF: predicated region fallthrough
CT: control target
= control target key end

     0   :  { %18 = vsyncpa [#allocation3], 0  ;;  %s2160_s0 = inlined_call_operand.vmem [shape: f32[2,16,8], index: 0, kind: input, shape index: {}]   ;;  %s2161_s1 = inlined_call_operand.hbm [shape: f32[2,8,8], index: 1, kind: input, shape index: {}]   ;;  %s2162_s2 = inlined_call_operand.hbm [shape: f32[1,8], index: 2, kind: input, shape index: {}]   ;;  %s2163_s3 = inlined_call_operand.hbm [shape: f32[2,8,8], index: 3, kind: input, shape index: {}]   ;;  %s2164_s4 = inlined_call_operand.hbm [shape: f32[1,8], index: 4, kind: input, shape index: {}]   ;;  %s2165_s5 = inlined_call_operand.hbm [shape: f32[2,8,32], index: 5, kind: input, shape index: {}]   ;;  %s2166_s6 = inlined_call_operand.hbm [shape: f32[1,32], index: 6, kind: input, shape index: {}]   ;;  %s2167_s7 = inlined_call_operand.vmem [shape: f32[2,32,32], index: 7, kind: input, shape index: {}]   ;;  %s2168_s8 = inlined_call_operand.hbm [shape: f32[1,32], index: 8, kind: input, shape index: {}]   ;;  %s2169_s9 = inlined_call_operand.hbm [shape: f32[8,32], index: 9, kind: input, shape index: {}]   ;;  %s2170_s10 = inlined_call_operand.hbm [shape: f32[1,32], index: 10, kind: input, shape index: {}]   ;;  %s2171_s11 = inlined_call_operand.vmem [shape: f32[32,64], index: 11, kind: input, shape index: {}]   ;;  %s2172_s12 = inlined_call_operand.hbm [shape: f32[1,64], index: 12, kind: input, shape index: {}]   ;;  %s2173_s13 = inlined_call_operand.hbm [shape: f32[2,64], index: 13, kind: output, shape index: {}]  }
   0x1   :  { %19 = vsyncpa [#allocation6], 0 }
   0x2   :  { %20 = vsyncpa [#allocation9], 0 }
   0x3   :  { %21 = vsyncpa [#allocation12], 0 }
   0x4   :  { %22 = vsyncpa [#allocation15], 0 }
   0x5   :  { %23 = vsyncpa [#allocation18], 0 }
   0x6   :  { %24 = vsyncpa [#allocation4], 0  ;;  %s1808_s25 = smov [#allocation5]   ;;  %s1809_s27 = smov [#allocation8]  }
   0x7   :  { %s45_s26 = sshll.u32 %s1808_s25, 4  ;;  %s67_s28 = sshll.u32 %s1809_s27, 4  ;;  %s46_s26 = int_to_ptr.vmem [resolvable:$true] %s45_s26  ;;  %s68_s28 = int_to_ptr.vmem [resolvable:$true] %s67_s28 }
   0x8   :  { %s1552_s14 = scalar_lea.hbm %s2162_s2, 16 }
   0x9   :  { %p1553_p0 = scmp.ne.s32.totalorder %s2162_s2, %s1552_s14  ;;  %p1556_p1 = scmp.lt.u32.totalorder %s1552_s14, %s2162_s2 }
   0xb   :  { %p1558_p2 = pnand %p1556_p1, %p1553_p0 }
   0xd   :  { %1561 = shalt.err (!%p1558_p2)
}
   0xe   :  { %s1562_s19 = scalar_lea.vmem %s46_s26, 16  ;;  %s1566_s20 = scalar_lea.vmem %s46_s26, 32 }
   0xf   :  { %p1563_p3 = scmp.ne.s32.totalorder %s46_s26, %s1562_s19  ;;  %p1567_p4 = scmp.lt.s32.totalorder %s46_s26, %s46_s26 }
  0x10   :  { %p1568_p5 = scmp.lt.s32.totalorder %s1566_s20, %s1562_s19 }
  0x12   :  { %p1569_p6 = por %p1568_p5, %p1567_p4 }
  0x14   :  { %p1570_p7 = pnand %p1569_p6, %p1563_p3 }
  0x16   :  { %1573 = shalt.err (!%p1570_p7)
}
  0x17   :  { %48 = dma.hbm_to_vmem [thread:$0]  %s2162_s2, 16, %s46_s26, [#allocation6]  }
  0x18   :  { %s1574_s25 = scalar_lea.hbm %s2164_s4, 16 }
  0x19   :  { %p1575_p8 = scmp.ne.s32.totalorder %s2164_s4, %s1574_s25  ;;  %p1578_p9 = scmp.lt.u32.totalorder %s1574_s25, %s2164_s4 }
  0x1b   :  { %p1580_p10 = pnand %p1578_p9, %p1575_p8 }
  0x1d   :  { %1583 = shalt.err (!%p1580_p10)
}
  0x1e   :  { %s1584_s15 = scalar_lea.vmem %s68_s28, 16  ;;  %s1588_s16 = scalar_lea.vmem %s68_s28, 32 }
  0x1f   :  { %p1585_p11 = scmp.ne.s32.totalorder %s68_s28, %s1584_s15  ;;  %p1589_p12 = scmp.lt.s32.totalorder %s68_s28, %s68_s28 }
  0x20   :  { %p1590_p13 = scmp.lt.s32.totalorder %s1588_s16, %s1584_s15 }
  0x22   :  { %p1591_p0 = por %p1590_p13, %p1589_p12 }
  0x24   :  { %p1592_p1 = pnand %p1591_p0, %p1585_p11 }
  0x26   :  { %1595 = shalt.err (!%p1592_p1)
}
  0x27   :  { %70 = dma.hbm_to_vmem [thread:$0]  %s2164_s4, 16, %s68_s28, [#allocation9]  }
  0x28   :  { %s1810_s17 = smov [#allocation11]   ;;  %s1811_s19 = smov [#allocation14]  }
  0x29   :  { %s89_s18 = sshll.u32 %s1810_s17, 4  ;;  %s111_s20 = sshll.u32 %s1811_s19, 4  ;;  %s90_s18 = int_to_ptr.vmem [resolvable:$true] %s89_s18  ;;  %s112_s20 = int_to_ptr.vmem [resolvable:$true] %s111_s20 }
  0x2a   :  { %s1596_s23 = scalar_lea.hbm %s2166_s6, 16 }
  0x2b   :  { %p1597_p2 = scmp.ne.s32.totalorder %s2166_s6, %s1596_s23  ;;  %p1600_p3 = scmp.lt.u32.totalorder %s1596_s23, %s2166_s6 }
  0x2d   :  { %p1602_p4 = pnand %p1600_p3, %p1597_p2 }
  0x2f   :  { %1605 = shalt.err (!%p1602_p4)
}
  0x30   :  { %s1606_s4 = scalar_lea.vmem %s90_s18, 16  ;;  %s1610_s28 = scalar_lea.vmem %s90_s18, 32 }
  0x31   :  { %p1607_p5 = scmp.ne.s32.totalorder %s90_s18, %s1606_s4  ;;  %p1611_p6 = scmp.lt.s32.totalorder %s90_s18, %s90_s18 }
  0x32   :  { %p1612_p7 = scmp.lt.s32.totalorder %s1610_s28, %s1606_s4 }
  0x34   :  { %p1613_p8 = por %p1612_p7, %p1611_p6 }
  0x36   :  { %p1614_p9 = pnand %p1613_p8, %p1607_p5 }
  0x38   :  { %1617 = shalt.err (!%p1614_p9)
}
  0x39   :  { %92 = dma.hbm_to_vmem [thread:$0]  %s2166_s6, 16, %s90_s18, [#allocation12]  }
  0x3a   :  { %s1618_s2 = scalar_lea.hbm %s2169_s9, 128 }
  0x3b   :  { %p1619_p10 = scmp.ne.s32.totalorder %s2169_s9, %s1618_s2  ;;  %p1622_p11 = scmp.lt.u32.totalorder %s1618_s2, %s2169_s9 }
  0x3d   :  { %p1624_p12 = pnand %p1622_p11, %p1619_p10 }
  0x3f   :  { %1627 = shalt.err (!%p1624_p12)
}
  0x40   :  { %s1628_s22 = scalar_lea.vmem %s112_s20, 128  ;;  %p1633_p0 = scmp.lt.s32.totalorder %s112_s20, %s112_s20 }
  0x41   :  { %p1629_p13 = scmp.ne.s32.totalorder %s112_s20, %s1628_s22  ;;  %p1634_p1 = scmp.lt.s32.totalorder %s1628_s22, %s1628_s22 }
  0x43   :  { %p1635_p2 = por %p1634_p1, %p1633_p0 }
  0x45   :  { %p1636_p3 = pnand %p1635_p2, %p1629_p13 }
  0x47   :  { %1639 = shalt.err (!%p1636_p3)
}
  0x48   :  { %114 = dma.hbm_to_vmem [thread:$0]  %s2169_s9, 128, %s112_s20, [#allocation15]  }
  0x49   :  { %s1812_s23 = smov [#allocation2]   ;;  %s1640_s29 = scalar_lea.hbm %s2161_s1, 256 }
  0x4a   :  { %s32_s24 = sshll.u32 %s1812_s23, 4  ;;  %p1641_p4 = scmp.ne.s32.totalorder %s2161_s1, %s1640_s29  ;;  %s33_s24 = int_to_ptr.vmem [resolvable:$true] %s32_s24 }
  0x4b   :  { %p1644_p5 = scmp.lt.u32.totalorder %s1640_s29, %s2161_s1 }
  0x4d   :  { %p1646_p6 = pnand %p1644_p5, %p1641_p4 }
  0x4f   :  { %1649 = shalt.err (!%p1646_p6)
}
  0x50   :  { %s1650_s15 = scalar_lea.vmem %s33_s24, 256  ;;  %p1655_p8 = scmp.lt.s32.totalorder %s33_s24, %s33_s24 }
  0x51   :  { %p1651_p7 = scmp.ne.s32.totalorder %s33_s24, %s1650_s15  ;;  %p1656_p9 = scmp.lt.s32.totalorder %s1650_s15, %s1650_s15 }
  0x53   :  { %p1657_p10 = por %p1656_p9, %p1655_p8 }
  0x55   :  { %p1658_p11 = pnand %p1657_p10, %p1651_p7 }
  0x57   :  { %1661 = shalt.err (!%p1658_p11)
}
  0x58   :  { %s1813_s9 = smov 128   ;;  %s1814_s20 = smov 8  }
  0x59   :  { %38 = dma.hbm_to_vmem [thread:$0]  %s2161_s1, 256, %s33_s24, [#allocation3], %s1813_s9, %s1813_s9, %s1814_s20  }
  0x5a   :  { %s1815_s26 = smov [#allocation7]   ;;  %s1816_s19 = smov [#allocation10]  }
  0x5b   :  { %s54_s17 = sshll.u32 %s1815_s26, 4  ;;  %s76_s21 = sshll.u32 %s1816_s19, 4  ;;  %s55_s17 = int_to_ptr.vmem [resolvable:$true] %s54_s17  ;;  %s77_s21 = int_to_ptr.vmem [resolvable:$true] %s76_s21 }
  0x5c   :  { %s1662_s18 = scalar_lea.hbm %s2163_s3, 256 }
  0x5d   :  { %p1663_p12 = scmp.ne.s32.totalorder %s2163_s3, %s1662_s18  ;;  %p1666_p13 = scmp.lt.u32.totalorder %s1662_s18, %s2163_s3 }
  0x5f   :  { %p1668_p0 = pnand %p1666_p13, %p1663_p12 }
  0x61   :  { %1671 = shalt.err (!%p1668_p0)
}
  0x62   :  { %s1672_s1 = scalar_lea.vmem %s55_s17, 256  ;;  %p1677_p2 = scmp.lt.s32.totalorder %s55_s17, %s55_s17 }
  0x63   :  { %p1673_p1 = scmp.ne.s32.totalorder %s55_s17, %s1672_s1  ;;  %p1678_p3 = scmp.lt.s32.totalorder %s1672_s1, %s1672_s1 }
  0x65   :  { %p1679_p4 = por %p1678_p3, %p1677_p2 }
  0x67   :  { %p1680_p5 = pnand %p1679_p4, %p1673_p1 }
  0x69   :  { %1683 = shalt.err (!%p1680_p5)
}
  0x6a   :  { %60 = dma.hbm_to_vmem [thread:$0]  %s2163_s3, 256, %s55_s17, [#allocation6], %s1813_s9, %s1813_s9, %s1814_s20  }
  0x6b   :  { %s1684_s14 = scalar_lea.hbm %s2165_s5, 256 }
  0x6c   :  { %p1685_p6 = scmp.ne.s32.totalorder %s2165_s5, %s1684_s14  ;;  %p1688_p7 = scmp.lt.u32.totalorder %s1684_s14, %s2165_s5 }
  0x6e   :  { %p1690_p8 = pnand %p1688_p7, %p1685_p6 }
  0x70   :  { %1693 = shalt.err (!%p1690_p8)
}
  0x71   :  { %s1694_s19 = scalar_lea.vmem %s77_s21, 256  ;;  %p1699_p10 = scmp.lt.s32.totalorder %s77_s21, %s77_s21 }
  0x72   :  { %p1695_p9 = scmp.ne.s32.totalorder %s77_s21, %s1694_s19  ;;  %p1700_p11 = scmp.lt.s32.totalorder %s1694_s19, %s1694_s19 }
  0x74   :  { %p1701_p12 = por %p1700_p11, %p1699_p10 }
  0x76   :  { %p1702_p13 = pnand %p1701_p12, %p1695_p9 }
  0x78   :  { %1705 = shalt.err (!%p1702_p13)
}
  0x79   :  { %82 = dma.hbm_to_vmem [thread:$0]  %s2165_s5, 256, %s77_s21, [#allocation9], %s1813_s9, %s1813_s9, %s1814_s20  }
  0x7a   :  { %s1817_s22 = smov [#allocation13]   ;;  %s1818_s18 = smov [#allocation16]  }
  0x7b   :  { %s101_s6 = sshll.u32 %s1817_s22, 4  ;;  %s121_s23 = sshll.u32 %s1818_s18, 4  ;;  %s102_s6 = int_to_ptr.vmem [resolvable:$true] %s101_s6  ;;  %s122_s23 = int_to_ptr.vmem [resolvable:$true] %s121_s23 }
  0x7c   :  { %s1706_s29 = scalar_lea.hbm %s2168_s8, 16 }
  0x7d   :  { %p1707_p0 = scmp.ne.s32.totalorder %s2168_s8, %s1706_s29  ;;  %p1710_p1 = scmp.lt.u32.totalorder %s1706_s29, %s2168_s8 }
  0x7f   :  { %p1712_p2 = pnand %p1710_p1, %p1707_p0 }
  0x81   :  { %1715 = shalt.err (!%p1712_p2)
}
  0x82   :  { %s1716_s5 = scalar_lea.vmem %s102_s6, 16  ;;  %s1720_s9 = scalar_lea.vmem %s102_s6, 32 }
  0x83   :  { %p1717_p3 = scmp.ne.s32.totalorder %s102_s6, %s1716_s5  ;;  %p1721_p4 = scmp.lt.s32.totalorder %s102_s6, %s102_s6 }
  0x84   :  { %p1722_p5 = scmp.lt.s32.totalorder %s1720_s9, %s1716_s5 }
  0x86   :  { %p1723_p6 = por %p1722_p5, %p1721_p4 }
  0x88   :  { %p1724_p7 = pnand %p1723_p6, %p1717_p3 }
  0x8a   :  { %1727 = shalt.err (!%p1724_p7)
}
  0x8b   :  { %104 = dma.hbm_to_vmem [thread:$0]  %s2168_s8, 16, %s102_s6, [#allocation12]  }
  0x8c   :  { %s1728_s15 = scalar_lea.hbm %s2170_s10, 16 }
  0x8d   :  { %p1729_p8 = scmp.ne.s32.totalorder %s2170_s10, %s1728_s15  ;;  %p1732_p9 = scmp.lt.u32.totalorder %s1728_s15, %s2170_s10 }
  0x8f   :  { %p1734_p10 = pnand %p1732_p9, %p1729_p8 }
  0x91   :  { %1737 = shalt.err (!%p1734_p10)
}
  0x92   :  { %s1738_s3 = scalar_lea.vmem %s122_s23, 16  ;;  %s1742_s17 = scalar_lea.vmem %s122_s23, 32 }
  0x93   :  { %p1739_p11 = scmp.ne.s32.totalorder %s122_s23, %s1738_s3  ;;  %p1743_p12 = scmp.lt.s32.totalorder %s122_s23, %s122_s23 }
  0x94   :  { %p1744_p13 = scmp.lt.s32.totalorder %s1742_s17, %s1738_s3 }
  0x96   :  { %p1745_p0 = por %p1744_p13, %p1743_p12 }
  0x98   :  { %p1746_p1 = pnand %p1745_p0, %p1739_p11 }
  0x9a   :  { %1749 = shalt.err (!%p1746_p1)
}
  0x9b   :  { %124 = dma.hbm_to_vmem [thread:$0]  %s2170_s10, 16, %s122_s23, [#allocation15]  }
  0x9c   :  { %s1819_s6 = smov [#allocation17]   ;;  %s1750_s29 = scalar_lea.hbm %s2172_s12, 16 }
  0x9d   :  { %s133_s18 = sshll.u32 %s1819_s6, 4  ;;  %p1751_p2 = scmp.ne.s32.totalorder %s2172_s12, %s1750_s29  ;;  %s134_s18 = int_to_ptr.vmem [resolvable:$true] %s133_s18 }
  0x9e   :  { %p1754_p3 = scmp.lt.u32.totalorder %s1750_s29, %s2172_s12 }
  0xa0   :  { %p1756_p4 = pnand %p1754_p3, %p1751_p2 }
  0xa2   :  { %1759 = shalt.err (!%p1756_p4)
}
  0xa3   :  { %s1760_s5 = scalar_lea.vmem %s134_s18, 16  ;;  %s1764_s10 = scalar_lea.vmem %s134_s18, 32 }
  0xa4   :  { %p1761_p5 = scmp.ne.s32.totalorder %s134_s18, %s1760_s5  ;;  %p1765_p6 = scmp.lt.s32.totalorder %s134_s18, %s134_s18 }
  0xa5   :  { %p1766_p7 = scmp.lt.s32.totalorder %s1764_s10, %s1760_s5 }
  0xa7   :  { %p1767_p8 = por %p1766_p7, %p1765_p6 }
  0xa9   :  { %p1768_p9 = pnand %p1767_p8, %p1761_p5 }
  0xab   :  { %1771 = shalt.err (!%p1768_p9)
}
  0xac   :  { %136 = dma.hbm_to_vmem [thread:$0]  %s2172_s12, 16, %s134_s18, [#allocation18]  }
  0xad   :  { %1794 = dma.done.wait [#allocation3], 256  }
  0xae   :  { %1795 = vsyncadd [#allocation3], 4294967040 }
  0xaf   :  { %1796 = dma.done.wait [#allocation6], 272  }
  0xb0   :  { %1797 = vsyncadd [#allocation6], 4294967024 }
  0xb1   :  { %1798 = dma.done.wait [#allocation9], 272  }
  0xb2   :  { %1799 = vsyncadd [#allocation9], 4294967024 }
  0xb3   :  { %1800 = dma.done.wait [#allocation12], 32  }
  0xb4   :  { %1801 = vsyncadd [#allocation12], 4294967264 }
  0xb5   :  { %1802 = dma.done.wait [#allocation15], 144  }
  0xb6   :  { %1803 = vsyncadd [#allocation15], 4294967152 }
  0xb7   :  { %1804 = dma.done.wait [#allocation18], 16  }
  0xb8   :  { %1805 = vsyncadd [#allocation18], 4294967280  ;;  %v188_v0 = vld [vmem:[#allocation2] sm:$0xff]  ;;  %vm177_vm0 = vcmask 1040384   ;;  %v172_v2 = vld [vmem:[#allocation2 + $0x8] sm:$0xff]  ;;  %vm189_vm1 = vcmask 64512  }
  0xb9   :  { %v2026_v1 = vld [vmem:[%s2160_s0] sm:$0xff]  ;;  %1403 = vmatprep.subr.mxu0 %v188_v0  ;;  %v2032_v4 = vld [vmem:[%s2160_s0 + $0x8] sm:$0xff]  ;;  %v2037_v5 = vld [vmem:[%s2160_s0 + $0x10] sm:$0xff]  ;;  %vm627_vm2 = vcmask 1041408   ;;  %vm865_vm3 = vcmask 261120   ;;  %vm1821_vm4 = vmmov 0  }
  0xba   :  { %v178_v3 = vrot.slane %v2026_v1, 7  ;;  %v2042_v6 = vld [vmem:[%s2160_s0 + $0x18] sm:$0xff]  ;;  %1404 = vmatpush3.msra.mxu0 %v188_v0  ;;  %v179_v7 = vrot.slane %v2032_v4, 7  ;;  %v181_v8 = vrot.slane %v2037_v5, 7  ;;  %v1308_v16 = vld [vmem:[#allocation5] ss:$0 sm:$0xff] }
  0xbb   :  { %v182_v9 = vrot.slane %v2042_v6, 7  ;;  %1411 = vmatprep.subr.mxu0 %v172_v2  ;;  %v409_v14 = vld [vmem:[#allocation7] sm:$0xff]  ;;  %v394_v15 = vld [vmem:[#allocation7 + $0x8] sm:$0xff]  ;;  %v638_v37 = vld [vmem:[#allocation10] sm:$0xff]  ;;  %vm1203_vm5 = vcmask 1041409   ;;  %vm1278_vm6 = vcmask 517120  }
  0xbc   :  { %v186_v10 = vsel %vm177_vm0, 0.0, %v178_v3  ;;  %v180_v11 = vsel %vm177_vm0, %v178_v3, %v179_v7  ;;  %v187_v12 = vsel %vm177_vm0, 0.0, %v181_v8  ;;  %1419 = vmatprep.subr.mxu1 %v409_v14  ;;  %v622_v38 = vld [vmem:[#allocation10 + $0x8] sm:$0xff]  ;;  %v1317_v39 = vld [vmem:[#allocation8] ss:$0 sm:$0xff] }
  0xbd   :  { %1405 = vmatprep.mubr.msk.f32.mxu0 %vm189_vm1, %v186_v10  ;;  %v183_v13 = vsel %vm177_vm0, %v181_v8, %v182_v9  ;;  %1420 = vmatpush3.msra.mxu1 %v409_v14  ;;  %v863_v8 = vld [vmem:[%s2167_s7 + $0x10] sm:$0xff]  ;;  %v864_v9 = vld [vmem:[%s2167_s7 + $0x18] sm:$0xff] }
  0xbe   :  { %1406 = vmatmul.mubr.msk.f32.vlgmr.msra.gmra.mrb[0].mxu0 %vm189_vm1, %v180_v11  ;;  %1427 = vmatprep.subr.mxu1 %v394_v15  ;;  %v1502_v10 = vpack.c.bf16 %v864_v9, %v863_v8  ;;  %v1327_v11 = vld [vmem:[%s2167_s7 + $0x20] sm:$0xff]  ;;  %v1326_v14 = vld [vmem:[#allocation11] ss:$0 sm:$0xff] }
  0xbf   :  { %1412 = vmatpush3.msra.mxu0 %v172_v2  ;;  %1408 = vmatprep.mubr.msk.f32.mxu0 %vm189_vm1, %v187_v12  ;;  %v1328_v12 = vld [vmem:[%s2167_s7 + $0x28] sm:$0xff] }
  0xc0   :  { %1435 = vmatprep.subr.mxu0 %v638_v37 }
  0xc2   :  { %1409 = vmatmul.mubr.msk.f32.gmra.mrb[2].mxu0 %vm189_vm1, %v183_v13  ;;  %v1506_v13 = vpack.c.bf16 %v1328_v12, %v1327_v11 }
  0xc3   :  { %1413 = vmatprep.mubr.msk.f32.mxu0 %vm189_vm1, %v2026_v1 }
  0xc6   :  { %1414 = vmatmul.mubr.msk.f32.vlgmr.msra.gmra.mrb[0].mxu0 %vm189_vm1, %v2032_v4 }
  0xc7   :  { %1416 = vmatprep.mubr.msk.f32.mxu0 %vm189_vm1, %v2037_v5  ;;  %1436 = vmatpush3.msra.mxu0 %v638_v37 }
  0xc8   :  { %1443 = vmatprep.subr.mxu0 %v622_v38 }
  0xca   :  { %1417 = vmatmul.mubr.msk.f32.gmra.mrb[2].mxu0 %vm189_vm1, %v2042_v6 }
 0x199   :  { %v1415_v17 = vpop.f32.mrb[0].mxu0 }
 0x19a   :  { %v386_v18 = vadd.f32 %v1415_v17, %v1308_v16  ;;  %v359_v19 = vpop.f32.mrb[1].mxu0 }
 0x19b   :  { %v385_v20 = vadd.f32 %v1308_v16, %v359_v19 }
 0x19c   :  { %v390_v21 = vmax.f32 %v386_v18, 0.0 }
 0x19d   :  { %v389_v22 = vmax.f32 %v385_v20, 0.0  ;;  %v1418_v23 = vpop.f32.mrb[2].mxu0 }
 0x19e   :  { %v400_v24 = vrot.slane %v390_v21, 7  ;;  %v388_v25 = vadd.f32 %v1418_v23, %v1308_v16  ;;  %v369_v26 = vpop.f32.mrb[3].mxu0 }
 0x19f   :  { %v387_v27 = vadd.f32 %v1308_v16, %v369_v26  ;;  %v399_v28 = vrot.slane %v389_v22, 7  ;;  %v1330_v26 = vld [vmem:[%s2167_s7 + $0x38] sm:$0xff] }
 0x1a0   :  { %v392_v29 = vmax.f32 %v388_v25, 0.0  ;;  %v1329_v25 = vld [vmem:[%s2167_s7 + $0x30] sm:$0xff] }
 0x1a1   :  { %v391_v30 = vmax.f32 %v387_v27, 0.0  ;;  %v407_v31 = vsel %vm177_vm0, 0.0, %v399_v28  ;;  %v401_v32 = vsel %vm177_vm0, %v399_v28, %v400_v24 }
 0x1a2   :  { %v403_v33 = vrot.slane %v392_v29, 7  ;;  %1421 = vmatprep.mubr.msk.f32.mxu1 %vm189_vm1, %v407_v31 }
 0x1a3   :  { %v402_v34 = vrot.slane %v391_v30, 7  ;;  %1422 = vmatmul.mubr.msk.f32.vlgmr.msra.gmra.mrb[0].mxu1 %vm189_vm1, %v401_v32 }
 0x1a4   :  { %1428 = vmatpush3.msra.mxu1 %v394_v15 }
 0x1a5   :  { %v408_v35 = vsel %vm177_vm0, 0.0, %v402_v34  ;;  %v404_v36 = vsel %vm177_vm0, %v402_v34, %v403_v33  ;;  %v1510_v34 = vpack.c.bf16 %v1330_v26, %v1329_v25 }
 0x1a6   :  { %1424 = vmatprep.mubr.msk.f32.mxu1 %vm189_vm1, %v408_v35 }
 0x1a7   :  { %1425 = vmatmul.mubr.msk.f32.gmra.mrb[2].mxu1 %vm189_vm1, %v404_v36 }
 0x1a8   :  { %1429 = vmatprep.mubr.msk.f32.mxu1 %vm189_vm1, %v389_v22 }
 0x1ab   :  { %1430 = vmatmul.mubr.msk.f32.vlgmr.msra.gmra.mrb[0].mxu1 %vm189_vm1, %v390_v21 }
 0x1ac   :  { %1432 = vmatprep.mubr.msk.f32.mxu1 %vm189_vm1, %v391_v30 }
 0x1af   :  { %1433 = vmatmul.mubr.msk.f32.gmra.mrb[2].mxu1 %vm189_vm1, %v392_v29 }
 0x27e   :  { %v1431_v40 = vpop.f32.mrb[0].mxu1 }
 0x27f   :  { %v606_v41 = vadd.f32 %v1431_v40, %v1317_v39  ;;  %v579_v42 = vpop.f32.mrb[1].mxu1 }
 0x280   :  { %v605_v43 = vadd.f32 %v1317_v39, %v579_v42  ;;  %v1190_v42 = vld [vmem:[%s2171_s11] sm:$0xff] }
 0x281   :  { %v610_v44 = vmax.f32 %v606_v41, 0.0 }
 0x282   :  { %v609_v45 = vmax.f32 %v605_v43, 0.0  ;;  %v1434_v46 = vpop.f32.mrb[2].mxu1  ;;  %v1191_v43 = vld [vmem:[%s2171_s11 + $0x8] sm:$0xff] }
 0x283   :  { %v614_v47 = vadd.f32 %v610_v44, %v2032_v4  ;;  %v608_v48 = vadd.f32 %v1434_v46, %v1317_v39  ;;  %v589_v49 = vpop.f32.mrb[3].mxu1  ;;  %v1515_v44 = vpack.c.bf16 %v1191_v43, %v1190_v42  ;;  %v1192_v46 = vld [vmem:[%s2171_s11 + $0x10] sm:$0xff] }
 0x284   :  { %v613_v50 = vadd.f32 %v609_v45, %v2026_v1  ;;  %v607_v51 = vadd.f32 %v1317_v39, %v589_v49  ;;  %v1069_v1 = vld [vmem:[#allocation14] sm:$0xff]  ;;  %v1820_v45 = vmov 0.0|0.0   ;;  %v1822_v49 = vmov 0.0  }
 0x285   :  { %v618_v52 = vmax.f32 %v614_v47, 0.0  ;;  %v612_v53 = vmax.f32 %v608_v48, 0.0  ;;  %v1193_v47 = vld [vmem:[%s2171_s11 + $0x18] sm:$0xff]  ;;  %s1823_s11 = smov [#allocation19]  }
 0x286   :  { %v617_v54 = vmax.f32 %v613_v50, 0.0  ;;  %v611_v55 = vmax.f32 %v607_v51, 0.0  ;;  %v1518_v48 = vpack.c.bf16 %v1193_v47, %v1192_v46  ;;  %v1339_v50 = vld [vmem:[#allocation13] ss:$0 sm:$0xff]  ;;  %v1340_v51 = vld [vmem:[#allocation16] ss:$0 sm:$0xff] }
 0x287   :  { %v629_v56 = vrot.slane %v618_v52, 6  ;;  %v616_v57 = vadd.f32 %v612_v53, %v2042_v6  ;;  %v862_v6 = vld [vmem:[%s2167_s7 + $0x8] sm:$0xff]  ;;  %s1286_s30 = sshll.u32 %s1823_s11, 4  ;;  %s1287_s30 = int_to_ptr.vmem [resolvable:$true] %s1286_s30 }
 0x288   :  { %v615_v58 = vadd.f32 %v611_v55, %v2037_v5  ;;  %v628_v59 = vrot.slane %v617_v54, 6  ;;  %v861_v5 = vld [vmem:[%s2167_s7] sm:$0xff]  ;;  %s1772_s14 = scalar_lea.vmem %s1287_s30, 32  ;;  %p1777_p11 = scmp.lt.s32.totalorder %s1287_s30, %s1287_s30 }
 0x289   :  { %v620_v60 = vmax.f32 %v616_v57, 0.0  ;;  %v1498_v7 = vpack.c.bf16 %v862_v6, %v861_v5  ;;  %p1773_p10 = scmp.ne.s32.totalorder %s1287_s30, %s1772_s14  ;;  %p1778_p12 = scmp.lt.s32.totalorder %s1772_s14, %s1772_s14 }
 0x28a   :  { %v619_v61 = vmax.f32 %v615_v58, 0.0  ;;  %v636_v62 = vsel %vm627_vm2, 0.0, %v628_v59  ;;  %v630_v63 = vsel %vm627_vm2, %v628_v59, %v629_v56 }
 0x28b   :  { %1437 = vmatprep.mubr.msk.f32.mxu0 %vm189_vm1, %v636_v62  ;;  %v632_v0 = vrot.slane %v620_v60, 6  ;;  %1499 = vmatprep.subr.bf16.mxu1 %v1498_v7  ;;  %p1779_p13 = por %p1778_p12, %p1777_p11 }
 0x28c   :  { %1438 = vmatmul.mubr.msk.f32.vlgmr.msra.gmra.mrb[4].mxu0 %vm189_vm1, %v630_v63  ;;  %v631_v2 = vrot.slane %v619_v61, 6  ;;  %1501 = vmatpush3.bf16.msra.mxu1 %v1498_v7 }
 0x28d   :  { %1444 = vmatpush3.msra.mxu0 %v622_v38  ;;  %1503 = vmatprep.subr.bf16.mxu1 %v1502_v10  ;;  %p1780_p0 = pnand %p1779_p13, %p1773_p10 }
 0x28e   :  { %v637_v3 = vsel %vm627_vm2, 0.0, %v631_v2  ;;  %v633_v4 = vsel %vm627_vm2, %v631_v2, %v632_v0  ;;  %1479 = vmatprep.subr.mxu0 %v1069_v1 }
 0x28f   :  { %1440 = vmatprep.mubr.msk.f32.mxu0 %vm189_vm1, %v637_v3 }
 0x290   :  { %1441 = vmatmul.mubr.msk.f32.gmra.mrb[6].mxu0 %vm189_vm1, %v633_v4  ;;  %1505 = vmatpush3.bf16.msra.mxu1 %v1502_v10 }
 0x291   :  { %1445 = vmatprep.mubr.msk.f32.mxu0 %vm189_vm1, %v617_v54  ;;  %1507 = vmatprep.subr.bf16.mxu1 %v1506_v13 }
 0x294   :  { %1446 = vmatmul.mubr.msk.f32.vlgmr.msra.gmra.mrb[4].mxu0 %vm189_vm1, %v618_v52 }
 0x295   :  { %1448 = vmatprep.mubr.msk.f32.mxu0 %vm189_vm1, %v619_v61  ;;  %1480 = vmatpush3.msra.mxu0 %v1069_v1 }
 0x298   :  { %1449 = vmatmul.mubr.msk.f32.gmra.mrb[6].mxu0 %vm189_vm1, %v620_v60 }
 0x299   :  { %1481 = vmatprep.mubr.msk.f32.mxu0 %vm189_vm1, %v617_v54 }
 0x29c   :  { %1482 = vmatmul.mubr.msk.f32.vlgmr.msra.gmra.mrb[8].mxu0 %vm189_vm1, %v618_v52 }
 0x29d   :  { %1484 = vmatprep.mubr.msk.f32.mxu0 %vm189_vm1, %v619_v61 }
 0x2a0   :  { %1485 = vmatmul.mubr.msk.f32.gmra.mrb[10].mxu0 %vm189_vm1, %v620_v60 }
 0x367   :  { %v1447_v15 = vpop.f32.mrb[4].mxu0 }
 0x368   :  { %v835_v16 = vadd.f32 %v1447_v15, %v1326_v14  ;;  %v808_v17 = vpop.f32.mrb[5].mxu0 }
 0x369   :  { %v834_v18 = vadd.f32 %v1326_v14, %v808_v17 }
 0x36a   :  { %v839_v19 = vmax.f32 %v835_v16, 0.0 }
 0x36b   :  { %v838_v20 = vmax.f32 %v834_v18, 0.0  ;;  %v1450_v21 = vpop.f32.mrb[6].mxu0 }
 0x36c   :  { %v852_v22 = vrot.slane %v839_v19, 6  ;;  %v837_v23 = vadd.f32 %v1450_v21, %v1326_v14  ;;  %v818_v24 = vpop.f32.mrb[7].mxu0 }
 0x36d   :  { %v851_v27 = vrot.slane %v838_v20, 6  ;;  %v836_v28 = vadd.f32 %v1326_v14, %v818_v24 }
 0x36e   :  { %v841_v29 = vmax.f32 %v837_v23, 0.0 }
 0x36f   :  { %v853_v30 = vsel %vm627_vm2, %v851_v27, %v852_v22  ;;  %v840_v31 = vmax.f32 %v836_v28, 0.0  ;;  %v1483_v32 = vpop.f32.mrb[8].mxu0  ;;  %v859_v33 = vsel %vm627_vm2, 0.0, %v851_v27 }
 0x370   :  { %v855_v35 = vrot.slane %v841_v29, 6  ;;  %1459 = vmatprep.mubr.msk.f32.mxu1 %vm865_vm3, %v859_v33  ;;  %v1143_v36 = vpop.f32.mrb[9].mxu0  ;;  %v1149_v56 = vadd.f32 %v1483_v32, %v1340_v51  ;;  %v1345_v33 = vld [vmem:[#allocation17] ss:$0 sm:$0xff] }
 0x371   :  { %v854_v37 = vrot.slane %v840_v31, 6  ;;  %1460 = vmatmul.mubr.msk.f32.vlgmr.msra.gmra.mrb[4].mxu1 %vm865_vm3, %v853_v30  ;;  %v1144_v58 = vadd.f32 %v1340_v51, %v1143_v36 }
 0x372   :  { %1509 = vmatpush3.bf16.msra.mxu1 %v1506_v13 }
 0x373   :  { %v1486_v38 = vpop.f32.mrb[10].mxu0  ;;  %v860_v39 = vsel %vm627_vm2, 0.0, %v854_v37  ;;  %1511 = vmatprep.subr.bf16.mxu1 %v1510_v34  ;;  %v856_v40 = vsel %vm627_vm2, %v854_v37, %v855_v35 }
 0x374   :  { %1462 = vmatprep.mubr.msk.f32.mxu1 %vm865_vm3, %v860_v39  ;;  %v1153_v41 = vpop.f32.mrb[11].mxu0  ;;  %v1159_v2 = vadd.f32 %v1486_v38, %v1340_v51 }
 0x375   :  { %1463 = vmatmul.mubr.msk.f32.gmra.mrb[6].mxu1 %vm865_vm3, %v856_v40  ;;  %v1154_v5 = vadd.f32 %v1340_v51, %v1153_v41 }
 0x376   :  { %1513 = vmatpush3.bf16.msra.mxu1 %v1510_v34  ;;  %1473 = vmatprep.mubr.msk.f32.mxu1 %vm865_vm3, %v838_v20 }
 0x377   :  { %1514 = vmatprep.subr.bf16.mxu1 %v1820_v45 }
 0x379   :  { %1474 = vmatmul.mubr.msk.f32.vlgmr.msra.gmra.mrb[4].mxu1 %vm865_vm3, %v839_v19 }
 0x37a   :  { %1476 = vmatprep.mubr.msk.f32.mxu1 %vm865_vm3, %v840_v31  ;;  %1516 = vmatpush3.bf16.msra.mxu1 %v1515_v44 }
 0x37b   :  { %1517 = vmatprep.subr.bf16.mxu1 %v1820_v45 }
 0x37d   :  { %1477 = vmatmul.mubr.msk.f32.gmra.mrb[6].mxu1 %vm865_vm3, %v841_v29 }
 0x37e   :  { %1495 = vmatprep.mubr.msk.f32.mxu1 %vm1821_vm4, %v1822_v49  ;;  %1519 = vmatpush3.bf16.msra.mxu1 %v1518_v48 }
 0x44c   :  { %v1475_v52 = vpop.f32.mrb[4].mxu1 }
 0x44d   :  { %v1062_v53 = vadd.f32 %v1475_v52, %v1339_v50  ;;  %v1035_v54 = vpop.f32.mrb[5].mxu1 }
 0x44e   :  { %v1061_v55 = vadd.f32 %v1339_v50, %v1035_v54 }
 0x44f   :  { %v1066_v57 = vmax.f32 %v1062_v53, 0.0 }
 0x450   :  { %v1065_v59 = vmax.f32 %v1061_v55, 0.0  ;;  %v1478_v60 = vpop.f32.mrb[6].mxu1 }
 0x451   :  { %v1163_v61 = vadd.f32 %v1149_v56, %v1066_v57  ;;  %v1064_v62 = vadd.f32 %v1478_v60, %v1339_v50  ;;  %v1045_v63 = vpop.f32.mrb[7].mxu1 }
 0x452   :  { %v1162_v0 = vadd.f32 %v1144_v58, %v1065_v59  ;;  %v1063_v1 = vadd.f32 %v1339_v50, %v1045_v63 }
 0x453   :  { %v1167_v3 = vmax.f32 %v1163_v61, 0.0  ;;  %v1068_v4 = vmax.f32 %v1064_v62, 0.0 }
 0x454   :  { %v1166_v6 = vmax.f32 %v1162_v0, 0.0  ;;  %v1067_v7 = vmax.f32 %v1063_v1, 0.0 }
 0x455   :  { %v1171_v8 = vsel %vm865_vm3, %v1167_v3, 0.0  ;;  %v1165_v9 = vadd.f32 %v1159_v2, %v1068_v4 }
 0x456   :  { %v1170_v10 = vsel %vm865_vm3, %v1166_v6, 0.0  ;;  %v1164_v11 = vadd.f32 %v1154_v5, %v1067_v7 }
 0x457   :  { %v1172_v12 = vadd.f32 %v1171_v8, %v1170_v10  ;;  %v1169_v13 = vmax.f32 %v1165_v9, 0.0 }
 0x458   :  { %v1168_v14 = vmax.f32 %v1164_v11, 0.0 }
 0x459   :  { %v1173_v15 = vrot.slane %v1172_v12, 4  ;;  %v1180_v16 = vsel %vm865_vm3, %v1169_v13, 0.0 }
 0x45a   :  { %v1179_v17 = vsel %vm865_vm3, %v1168_v14, 0.0 }
 0x45b   :  { %v1174_v18 = vadd.f32 %v1173_v15, %v1172_v12  ;;  %v1181_v19 = vadd.f32 %v1180_v16, %v1179_v17 }
 0x45d   :  { %v1175_v20 = vrot.slane %v1174_v18, 2  ;;  %v1182_v21 = vrot.slane %v1181_v19, 4 }
 0x45f   :  { %v1176_v22 = vadd.f32 %v1175_v20, %v1174_v18  ;;  %v1183_v23 = vadd.f32 %v1182_v21, %v1181_v19 }
 0x461   :  { %v1177_v24 = vrot.slane %v1176_v22, 1  ;;  %v1184_v25 = vrot.slane %v1183_v23, 2 }
 0x463   :  { %v1185_v26 = vadd.f32 %v1184_v25, %v1183_v23  ;;  %v1178_v27 = vadd.f32 %v1177_v24, %v1176_v22 }
 0x465   :  { %v1186_v28 = vrot.slane %v1185_v26, 1  ;;  %v1188_v30 = vmul.f32 0.0625, %v1178_v27 }
 0x467   :  { %v1187_v29 = vadd.f32 %v1186_v28, %v1185_v26 }
 0x469   :  { %v1189_v31 = vmul.f32 0.0625, %v1187_v29 }
 0x46b   :  { %v1204_v32 = vsel %vm1203_vm5, %v1189_v31, %v1188_v30 }
 0x46c   :  { %1496 = vmatmul.mubr.msk.f32.vlgmr.msra.gmra.mrb[8].mxu1 %vm865_vm3, %v1204_v32 }
 0x53f   :  { %v1273_v34 = vpop.f32.mrb[8].mxu1 }
 0x540   :  { %v1274_v35 = vadd.f32 %v1345_v33, %v1273_v34  ;;  %v1497_v36 = vpop.f32.mrb[9].mxu1 }
 0x542   :  { %v1277_v37 = vmax.f32 %v1274_v35, 0.0 }
 0x544   :  { %1279 = vst.msk [vmem:[#allocation19] sm:$0x3] %vm1278_vm6, %v1277_v37 }
 0x545   :  { %1783 = shalt.err (!%p1780_p0)
}
 0x546   :  { %s1784_s2 = scalar_lea.hbm %s2173_s13, 32 }
 0x547   :  { %p1785_p1 = scmp.ne.s32.totalorder %s2173_s13, %s1784_s2  ;;  %p1788_p2 = scmp.lt.u32.totalorder %s1784_s2, %s2173_s13 }
 0x549   :  { %p1790_p3 = pnand %p1788_p2, %p1785_p1 }
 0x54b   :  { %1793 = shalt.err (!%p1790_p3)
}
 0x54c   :  { %1289 = dma.vmem_to_hbm [thread:$0]  %s1287_s30, 32, %s2173_s13, [#allocation4]  }
 0x54d   :  { %1806 = dma.done.wait [#allocation4], 32  }
 0x54e   :  { %1807 = vsyncadd [#allocation4], 4294967264 }
 0x54f   :  { %1293 = vsyncpa [#allocation3], 1 }
 0x550   :  { %1294 = vsyncpa [#allocation6], 1 }
 0x551   :  { %1295 = vsyncpa [#allocation9], 1 }
 0x552   :  { %1296 = vsyncpa [#allocation12], 1 }
 0x553   :  { %1297 = vsyncpa [#allocation15], 1 }
 0x554   :  { %1298 = vsyncpa [#allocation18], 1 }
 0x555   :  { %1299 = vsyncpa [#allocation4], 1 }

</bundles_post_ra>
